<compile_context>
chip_gen: v5e
topology: v5e:2x2
jax: 0.10.0
libtpu: 0.0.40
codegen_flags: <defaults>
</compile_context>

<pallas_src>
import jax
import jax.numpy as jnp
import numpy as np
from jax import lax
from jax.experimental import pallas as pl
from jax.experimental.pallas import tpu as pltpu


_NEG_INF = -1e30   # large finite negative (safe for masking, no inf-inf NaNs)


def _round_up(x, m):
    return ((x + m - 1) // m) * m


def _choose_seq_tile(T, override=None):
    # 256 fills the v6e/v7x 256-wide MXU and amortizes per-grid-step overhead.
    # (On v5e 128 would also be fine; 256 is still correct and VMEM is ample.)
    if override is not None:
        tile = override
    elif T >= 256:
        tile = 256
    elif T >= 128:
        tile = 128
    else:
        tile = _round_up(max(T, 1), 8)
    T_pad = _round_up(T, tile)
    return tile, T_pad


def _vmem_limit_bytes():
    # Per-generation VMEM limit: leave ~25% headroom for Mosaic-internal scratch.
    cap = None
    try:
        info = pltpu.get_tpu_info()
        cap = getattr(info, "vmem_capacity_bytes", None)
    except Exception:
        cap = None
    if cap is None:
        cap = 64 * 1024 * 1024          # conservative default (v7x per-TC VMEM)
    return int(min(cap - cap // 4, 100 * 1024 * 1024))


# --------------------------------- kernels ------------------------------------

def qkv_kernel(x_ref, w_ref, q_ref, k_ref, v_ref):
    # x_ref: (1, Tt, C) bf16;  w_ref: (C, 3C) bf16 (pre-transposed, [q*scale|k|v])
    # q/k/v_ref: (1, H, Tt, hs) bf16 -- heads split in-kernel (no XLA transpose).
    _, H, _, hs = q_ref.shape
    C = H * hs
    y = jnp.dot(x_ref[0], w_ref[...],
                preferred_element_type=jnp.float32).astype(q_ref.dtype)  # (Tt,3C)
    for h in range(H):                       # trace-time loop; static lane slices
        q_ref[0, h, :, :] = y[:, h * hs:(h + 1) * hs]
        k_ref[0, h, :, :] = y[:, C + h * hs:C + (h + 1) * hs]
        v_ref[0, h, :, :] = y[:, 2 * C + h * hs:2 * C + (h + 1) * hs]


def attn_proj_kernel(qi_tab, ki_tab, q_ref, k_ref, v_ref, wp_ref, bp_ref,
                     o_ref, m_sc, l_sc, acc_sc):
    # q_ref: (1,H,TQ,hs) bf16; k/v_ref: (1,H,TKV,hs) bf16
    # wp_ref: (C,C) bf16 (pre-transposed); bp_ref: (1,C) f32; o_ref: (1,TQ,C) f32
    _, H, TQ, hs = q_ref.shape
    TKV = k_ref.shape[2]
    C = H * hs
    s_idx = pl.program_id(1)
    qi = qi_tab[s_idx]
    ki = ki_tab[s_idx]
    last_ki = ((qi + 1) * TQ - 1) // TKV        # last kv tile needed by this q tile

    @pl.when(ki == 0)
    def _init():
        m_sc[...] = jnp.full_like(m_sc, _NEG_INF)
        l_sc[...] = jnp.zeros_like(l_sc)
        acc_sc[...] = jnp.zeros_like(acc_sc)

    def flash_step(apply_mask):
        q = q_ref[0]                            # (H, TQ, hs)  (scale folded in Wq)
        k = k_ref[0]
        v = v_ref[0]
        s = jnp.einsum('hqd,hkd->hqk', q, k,
                       preferred_element_type=jnp.float32)       # (H,TQ,TKV) f32
        if apply_mask:
            # Tile-local causal mask (only traced for diagonal-crossing tiles).
            row = qi * TQ + lax.broadcasted_iota(jnp.int32, (TQ, TKV), 0)
            col = ki * TKV + lax.broadcasted_iota(jnp.int32, (TQ, TKV), 1)
            s = jnp.where((col <= row)[None, :, :], s, _NEG_INF)
        m_prev = m_sc[...]                                        # (H, TQ, 1)
        m_new = jnp.maximum(m_prev, jnp.max(s, axis=-1, keepdims=True))
        alpha = jnp.exp(m_prev - m_new)
        p = jnp.exp(s - m_new)
        l_sc[...] = alpha * l_sc[...] + jnp.sum(p, axis=-1, keepdims=True)
        acc_sc[...] = alpha * acc_sc[...] + jnp.einsum(
            'hqk,hkd->hqd', p.astype(v.dtype), v,
            preferred_element_type=jnp.float32)
        m_sc[...] = m_new

    # Interior (fully visible) kv tiles skip the mask construction entirely.
    crosses_diag = ki * TKV + (TKV - 1) > qi * TQ

    @pl.when(crosses_diag)
    def _masked():
        flash_step(apply_mask=True)

    @pl.when(jnp.logical_not(crosses_diag))
    def _unmasked():
        flash_step(apply_mask=False)

    @pl.when(ki == last_ki)
    def _finalize():
        inv_l = pl.reciprocal(l_sc[...], approx=True)
        o_h = (acc_sc[...] * inv_l).astype(jnp.bfloat16)          # (H, TQ, hs)
        # Fused head-merge + output projection (lane-dense (TQ, C) write):
        #   concat_h(o_h) @ Wp + b  ==  sum_h o_h[h] @ Wp[h*hs:(h+1)*hs, :] + b
        res = jnp.zeros((TQ, C), jnp.float32) + bp_ref[...]
        for h in range(H):                   # trace-time loop; static row slices
            res = res + jnp.dot(o_h[h], wp_ref[h * hs:(h + 1) * hs, :],
                                preferred_element_type=jnp.float32)
        o_ref[0] = res.astype(o_ref.dtype)


# --------------------------------- wrapper ------------------------------------

def multi_head_attention(x, wq, wk, wv, wproj, bproj, n_heads, *, seq_tile=None):
    """x: (B,T,C) f32. wq/wk/wv/wproj: (C,C) f32 in (in,out) layout. bproj: (1,C)."""
    B, T, C = x.shape
    H = n_heads
    hs = C // H
    tile, T_pad = _choose_seq_tile(T, seq_tile)
    nT = T_pad // tile
    scale = float(hs) ** -0.5

    x_bf = x.astype(jnp.bfloat16)
    if T_pad != T:
        # Padded key columns are masked by causality; padded query rows sliced off.
        x_bf = jnp.pad(x_bf, ((0, 0), (0, T_pad - T), (0, 0)))

    # Pre-transposed (in,out) weights in bf16; 1/sqrt(hs) folded into q columns.
    wqkv_bf = jnp.concatenate([wq * scale, wk, wv], axis=1).astype(jnp.bfloat16)
    wproj_bf = wproj.astype(jnp.bfloat16)
    bproj_f32 = bproj.astype(jnp.float32).reshape(1, C)

    vmem = _vmem_limit_bytes()
    cp_qkv = pltpu.CompilerParams(dimension_semantics=("parallel", "parallel"),
                                  vmem_limit_bytes=vmem)
    cp_attn = pltpu.CompilerParams(dimension_semantics=("parallel", "arbitrary"),
                                   vmem_limit_bytes=vmem)

    # ---- 1) fused QKV projection, heads split in-kernel -> (B,H,T_pad,hs) x3 ----
    qkv_out_spec = pl.BlockSpec((1, H, tile, hs), lambda b, t: (b, 0, t, 0))
    qh, kh, vh = pl.pallas_call(
        qkv_kernel,
        out_shape=(jax.ShapeDtypeStruct((B, H, T_pad, hs), jnp.bfloat16),
                   jax.ShapeDtypeStruct((B, H, T_pad, hs), jnp.bfloat16),
                   jax.ShapeDtypeStruct((B, H, T_pad, hs), jnp.bfloat16)),
        grid=(B, nT),
        in_specs=[
            pl.BlockSpec((1, tile, C), lambda b, t: (b, t, 0)),
            pl.BlockSpec((C, 3 * C), lambda b, t: (0, 0),
                         pipeline_mode=pl.Buffered(1)),     # constant weight: 1 copy
        ],
        out_specs=(qkv_out_spec, qkv_out_spec, qkv_out_spec),
        compiler_params=cp_qkv,
    )(x_bf, wqkv_bf)

    # ---- lower-triangular (q-tile, kv-tile) schedule (scalar-prefetched) ----
    qi_list, ki_list = [], []
    for q_i in range(nT):
        last = ((q_i + 1) * tile - 1) // tile            # == q_i for TQ == TKV
        for k_i in range(last + 1):
            qi_list.append(q_i)
            ki_list.append(k_i)
    qi_tab = jnp.asarray(qi_list, dtype=jnp.int32)
    ki_tab = jnp.asarray(ki_list, dtype=jnp.int32)
    n_steps = len(qi_list)

    # ---- 2) flash attention + fused head-merge / output projection ----
    out = pl.pallas_call(
        attn_proj_kernel,
        out_shape=jax.ShapeDtypeStruct((B, T_pad, C), jnp.float32),
        grid_spec=pltpu.PrefetchScalarGridSpec(
            num_scalar_prefetch=2,
            grid=(B, n_steps),
            in_specs=[
                pl.BlockSpec((1, H, tile, hs),
                             lambda b, s, qi, ki: (b, 0, qi[s], 0)),
                pl.BlockSpec((1, H, tile, hs),
                             lambda b, s, qi, ki: (b, 0, ki[s], 0)),
                pl.BlockSpec((1, H, tile, hs),
                             lambda b, s, qi, ki: (b, 0, ki[s], 0)),
                pl.BlockSpec((C, C), lambda b, s, qi, ki: (0, 0),
                             pipeline_mode=pl.Buffered(1)),   # constant proj weight
                pl.BlockSpec((1, C), lambda b, s, qi, ki: (0, 0)),
            ],
            out_specs=pl.BlockSpec((1, tile, C),
                                   lambda b, s, qi, ki: (b, qi[s], 0)),
            scratch_shapes=[
                pltpu.VMEM((H, tile, 1), jnp.float32),    # running max m
                pltpu.VMEM((H, tile, 1), jnp.float32),    # running sum l
                pltpu.VMEM((H, tile, hs), jnp.float32),   # output accumulator
            ],
        ),
        compiler_params=cp_attn,
    )(qi_tab, ki_tab, qh, kh, vh, wproj_bf, bproj_f32)

    if T_pad != T:
        out = out[:, :T, :]
    return out


# ----------------------------- pure-JAX reference ------------------------------

def mha_reference(x, wq, wk, wv, wproj, bproj, n_heads):
    B, T, C = x.shape
    hs = C // n_heads

    def split(y):
        return y.reshape(B, T, n_heads, hs).transpose(0, 2, 1, 3)

    q, k, v = split(x @ wq), split(x @ wk), split(x @ wv)
    s = jnp.einsum('bhqd,bhkd->bhqk', q, k) * (hs ** -0.5)
    mask = jnp.tril(jnp.ones((T, T), dtype=bool))
    s = jnp.where(mask, s, -jnp.inf)
    p = jax.nn.softmax(s, axis=-1)
    o = jnp.einsum('bhqk,bhkd->bhqd', p, v)
    o = o.transpose(0, 2, 1, 3).reshape(B, T, C)
    return o @ wproj + bproj


# ------------------------------------ main --------------------------------------

def init_mha_params(key, n_embd):
    C = n_embd
    std = C ** -0.5
    kq, kk, kv, kp, kb = jax.random.split(key, 5)
    wq = std * jax.random.normal(kq, (C, C), jnp.float32)   # (in,out); head h -> cols [h*hs:(h+1)*hs)
    wk = std * jax.random.normal(kk, (C, C), jnp.float32)
    wv = std * jax.random.normal(kv, (C, C), jnp.float32)
    wproj = std * jax.random.normal(kp, (C, C), jnp.float32)
    bproj = 0.1 * jax.random.normal(kb, (1, C), jnp.float32)
    return wq, wk, wv, wproj, bproj


if __name__ == "__main__":
    key = jax.random.PRNGKey(0)

    # Primary small case: batch=2, seq=8, n_embd=32, n_heads=4.
    B, T, C, H = 2, 8, 32, 4
    kx, kp = jax.random.split(key)
    x = jax.random.normal(kx, (B, T, C), jnp.float32)
    wq, wk, wv, wproj, bproj = init_mha_params(kp, C)

    out = multi_head_attention(x, wq, wk, wv, wproj, bproj, n_heads=H)
    jax.block_until_ready(out)
    assert out.shape == (B, T, C)
    ref = mha_reference(x, wq, wk, wv, wproj, bproj, n_heads=H)
    np.testing.assert_allclose(np.asarray(out), np.asarray(ref), rtol=3e-2, atol=3e-2)

    # Multi-tile check: T=32 with seq_tile=8 exercises the triangular grid,
    # the mask-skip (interior) path and the accumulator init/finalize logic.
    T2 = 32
    x2 = jax.random.normal(jax.random.PRNGKey(1), (B, T2, C), jnp.float32)
    out2 = multi_head_attention(x2, wq, wk, wv, wproj, bproj, n_heads=H, seq_tile=8)
    ref2 = mha_reference(x2, wq, wk, wv, wproj, bproj, n_heads=H)
    np.testing.assert_allclose(np.asarray(out2), np.asarray(ref2), rtol=3e-2, atol=3e-2)

    # Non-divisible T exercises the padding path (T=12 -> padded to 16, tile=8).
    T3 = 12
    x3 = jax.random.normal(jax.random.PRNGKey(2), (B, T3, C), jnp.float32)
    out3 = multi_head_attention(x3, wq, wk, wv, wproj, bproj, n_heads=H, seq_tile=8)
    ref3 = mha_reference(x3, wq, wk, wv, wproj, bproj, n_heads=H)
    np.testing.assert_allclose(np.asarray(out3), np.asarray(ref3), rtol=3e-2, atol=3e-2)

    print("KERNEL_OK")
</pallas_src>

<mosaic_0001>
module attributes {stable_mosaic.version = 11 : i64} {
  func.func @qkv_kernel(%arg0: i32, %arg1: i32, %arg2: memref<1x8x32xbf16, #tpu.memory_space<vmem>>, %arg3: memref<32x96xbf16, #tpu.memory_space<vmem>>, %arg4: memref<1x4x8x8xbf16, #tpu.memory_space<vmem>>, %arg5: memref<1x4x8x8xbf16, #tpu.memory_space<vmem>>, %arg6: memref<1x4x8x8xbf16, #tpu.memory_space<vmem>>) attributes {dimension_semantics = [#tpu.dimension_semantics<parallel>, #tpu.dimension_semantics<parallel>], iteration_bounds = array<i64: 2, 1>, scalar_prefetch = 0 : i64, scratch_operands = 0 : i64, tpu.core_type = #tpu.core_type<tc>, window_params = [{transform_indices = @transform_0, window_bounds = array<i64: 1, 8, 32>}, {pipeline_mode = #tpu.pipeline_mode<synchronous>, transform_indices = @transform_1, window_bounds = array<i64: 32, 96>}, {transform_indices = @transform_2, window_bounds = array<i64: 1, 4, 8, 8>}, {transform_indices = @transform_3, window_bounds = array<i64: 1, 4, 8, 8>}, {transform_indices = @transform_4, window_bounds = array<i64: 1, 4, 8, 8>}]} {
    %c0 = arith.constant 0 : index
    %c0_0 = arith.constant 0 : index
    %c0_1 = arith.constant 0 : index
    %0 = vector.load %arg2[%c0, %c0_0, %c0_1] : memref<1x8x32xbf16, #tpu.memory_space<vmem>>, vector<1x8x32xbf16>
    %1 = vector.shape_cast %0 : vector<1x8x32xbf16> to vector<8x32xbf16>
    %c0_2 = arith.constant 0 : index
    %c0_3 = arith.constant 0 : index
    %2 = vector.load %arg3[%c0_2, %c0_3] : memref<32x96xbf16, #tpu.memory_space<vmem>>, vector<32x96xbf16>
    %cst = arith.constant dense<0.000000e+00> : vector<8x96xf32>
    %3 = tpu.matmul %1, %2, %cst {dimension_numbers = #tpu.dot_dimension_numbers<[1], [0], [0], [1], [0, 0, 1, 1], [], []>} : vector<8x32xbf16>, vector<32x96xbf16>, vector<8x96xf32> -> vector<8x96xf32>
    %4 = arith.truncf %3 : vector<8x96xf32> to vector<8x96xbf16>
    %5 = vector.extract_strided_slice %4 {offsets = [0, 0], sizes = [8, 8], strides = [1, 1]} : vector<8x96xbf16> to vector<8x8xbf16>
    %c0_4 = arith.constant 0 : index
    %c0_5 = arith.constant 0 : index
    %c0_6 = arith.constant 0 : index
    %c0_7 = arith.constant 0 : index
    %6 = vector.load %arg4[%c0_4, %c0_5, %c0_6, %c0_7] : memref<1x4x8x8xbf16, #tpu.memory_space<vmem>>, vector<1x1x8x8xbf16>
    %7 = vector.shape_cast %6 : vector<1x1x8x8xbf16> to vector<8x8xbf16>
    %8 = vector.shape_cast %5 : vector<8x8xbf16> to vector<1x1x8x8xbf16>
    tpu.vector_store %arg4[%c0_4, %c0_5, %c0_6, %c0_7], %8 {strides = array<i32>} : memref<1x4x8x8xbf16, #tpu.memory_space<vmem>>, vector<1x1x8x8xbf16>,
    %9 = vector.extract_strided_slice %4 {offsets = [0, 32], sizes = [8, 8], strides = [1, 1]} : vector<8x96xbf16> to vector<8x8xbf16>
    %c0_8 = arith.constant 0 : index
    %c0_9 = arith.constant 0 : index
    %c0_10 = arith.constant 0 : index
    %c0_11 = arith.constant 0 : index
    %10 = vector.load %arg5[%c0_8, %c0_9, %c0_10, %c0_11] : memref<1x4x8x8xbf16, #tpu.memory_space<vmem>>, vector<1x1x8x8xbf16>
    %11 = vector.shape_cast %10 : vector<1x1x8x8xbf16> to vector<8x8xbf16>
    %12 = vector.shape_cast %9 : vector<8x8xbf16> to vector<1x1x8x8xbf16>
    tpu.vector_store %arg5[%c0_8, %c0_9, %c0_10, %c0_11], %12 {strides = array<i32>} : memref<1x4x8x8xbf16, #tpu.memory_space<vmem>>, vector<1x1x8x8xbf16>,
    %13 = vector.extract_strided_slice %4 {offsets = [0, 64], sizes = [8, 8], strides = [1, 1]} : vector<8x96xbf16> to vector<8x8xbf16>
    %c0_12 = arith.constant 0 : index
    %c0_13 = arith.constant 0 : index
    %c0_14 = arith.constant 0 : index
    %c0_15 = arith.constant 0 : index
    %14 = vector.load %arg6[%c0_12, %c0_13, %c0_14, %c0_15] : memref<1x4x8x8xbf16, #tpu.memory_space<vmem>>, vector<1x1x8x8xbf16>
    %15 = vector.shape_cast %14 : vector<1x1x8x8xbf16> to vector<8x8xbf16>
    %16 = vector.shape_cast %13 : vector<8x8xbf16> to vector<1x1x8x8xbf16>
    tpu.vector_store %arg6[%c0_12, %c0_13, %c0_14, %c0_15], %16 {strides = array<i32>} : memref<1x4x8x8xbf16, #tpu.memory_space<vmem>>, vector<1x1x8x8xbf16>,
    %17 = vector.extract_strided_slice %4 {offsets = [0, 8], sizes = [8, 8], strides = [1, 1]} : vector<8x96xbf16> to vector<8x8xbf16>
    %c0_16 = arith.constant 0 : index
    %c1 = arith.constant 1 : index
    %c0_17 = arith.constant 0 : index
    %c0_18 = arith.constant 0 : index
    %18 = vector.load %arg4[%c0_16, %c1, %c0_17, %c0_18] : memref<1x4x8x8xbf16, #tpu.memory_space<vmem>>, vector<1x1x8x8xbf16>
    %19 = vector.shape_cast %18 : vector<1x1x8x8xbf16> to vector<8x8xbf16>
    %20 = vector.shape_cast %17 : vector<8x8xbf16> to vector<1x1x8x8xbf16>
    tpu.vector_store %arg4[%c0_16, %c1, %c0_17, %c0_18], %20 {strides = array<i32>} : memref<1x4x8x8xbf16, #tpu.memory_space<vmem>>, vector<1x1x8x8xbf16>,
    %21 = vector.extract_strided_slice %4 {offsets = [0, 40], sizes = [8, 8], strides = [1, 1]} : vector<8x96xbf16> to vector<8x8xbf16>
    %c0_19 = arith.constant 0 : index
    %c1_20 = arith.constant 1 : index
    %c0_21 = arith.constant 0 : index
    %c0_22 = arith.constant 0 : index
    %22 = vector.load %arg5[%c0_19, %c1_20, %c0_21, %c0_22] : memref<1x4x8x8xbf16, #tpu.memory_space<vmem>>, vector<1x1x8x8xbf16>
    %23 = vector.shape_cast %22 : vector<1x1x8x8xbf16> to vector<8x8xbf16>
    %24 = vector.shape_cast %21 : vector<8x8xbf16> to vector<1x1x8x8xbf16>
    tpu.vector_store %arg5[%c0_19, %c1_20, %c0_21, %c0_22], %24 {strides = array<i32>} : memref<1x4x8x8xbf16, #tpu.memory_space<vmem>>, vector<1x1x8x8xbf16>,
    %25 = vector.extract_strided_slice %4 {offsets = [0, 72], sizes = [8, 8], strides = [1, 1]} : vector<8x96xbf16> to vector<8x8xbf16>
    %c0_23 = arith.constant 0 : index
    %c1_24 = arith.constant 1 : index
    %c0_25 = arith.constant 0 : index
    %c0_26 = arith.constant 0 : index
    %26 = vector.load %arg6[%c0_23, %c1_24, %c0_25, %c0_26] : memref<1x4x8x8xbf16, #tpu.memory_space<vmem>>, vector<1x1x8x8xbf16>
    %27 = vector.shape_cast %26 : vector<1x1x8x8xbf16> to vector<8x8xbf16>
    %28 = vector.shape_cast %25 : vector<8x8xbf16> to vector<1x1x8x8xbf16>
    tpu.vector_store %arg6[%c0_23, %c1_24, %c0_25, %c0_26], %28 {strides = array<i32>} : memref<1x4x8x8xbf16, #tpu.memory_space<vmem>>, vector<1x1x8x8xbf16>,
    %29 = vector.extract_strided_slice %4 {offsets = [0, 16], sizes = [8, 8], strides = [1, 1]} : vector<8x96xbf16> to vector<8x8xbf16>
    %c0_27 = arith.constant 0 : index
    %c2 = arith.constant 2 : index
    %c0_28 = arith.constant 0 : index
    %c0_29 = arith.constant 0 : index
    %30 = vector.load %arg4[%c0_27, %c2, %c0_28, %c0_29] : memref<1x4x8x8xbf16, #tpu.memory_space<vmem>>, vector<1x1x8x8xbf16>
    %31 = vector.shape_cast %30 : vector<1x1x8x8xbf16> to vector<8x8xbf16>
    %32 = vector.shape_cast %29 : vector<8x8xbf16> to vector<1x1x8x8xbf16>
    tpu.vector_store %arg4[%c0_27, %c2, %c0_28, %c0_29], %32 {strides = array<i32>} : memref<1x4x8x8xbf16, #tpu.memory_space<vmem>>, vector<1x1x8x8xbf16>,
    %33 = vector.extract_strided_slice %4 {offsets = [0, 48], sizes = [8, 8], strides = [1, 1]} : vector<8x96xbf16> to vector<8x8xbf16>
    %c0_30 = arith.constant 0 : index
    %c2_31 = arith.constant 2 : index
    %c0_32 = arith.constant 0 : index
    %c0_33 = arith.constant 0 : index
    %34 = vector.load %arg5[%c0_30, %c2_31, %c0_32, %c0_33] : memref<1x4x8x8xbf16, #tpu.memory_space<vmem>>, vector<1x1x8x8xbf16>
    %35 = vector.shape_cast %34 : vector<1x1x8x8xbf16> to vector<8x8xbf16>
    %36 = vector.shape_cast %33 : vector<8x8xbf16> to vector<1x1x8x8xbf16>
    tpu.vector_store %arg5[%c0_30, %c2_31, %c0_32, %c0_33], %36 {strides = array<i32>} : memref<1x4x8x8xbf16, #tpu.memory_space<vmem>>, vector<1x1x8x8xbf16>,
    %37 = vector.extract_strided_slice %4 {offsets = [0, 80], sizes = [8, 8], strides = [1, 1]} : vector<8x96xbf16> to vector<8x8xbf16>
    %c0_34 = arith.constant 0 : index
    %c2_35 = arith.constant 2 : index
    %c0_36 = arith.constant 0 : index
    %c0_37 = arith.constant 0 : index
    %38 = vector.load %arg6[%c0_34, %c2_35, %c0_36, %c0_37] : memref<1x4x8x8xbf16, #tpu.memory_space<vmem>>, vector<1x1x8x8xbf16>
    %39 = vector.shape_cast %38 : vector<1x1x8x8xbf16> to vector<8x8xbf16>
    %40 = vector.shape_cast %37 : vector<8x8xbf16> to vector<1x1x8x8xbf16>
    tpu.vector_store %arg6[%c0_34, %c2_35, %c0_36, %c0_37], %40 {strides = array<i32>} : memref<1x4x8x8xbf16, #tpu.memory_space<vmem>>, vector<1x1x8x8xbf16>,
    %41 = vector.extract_strided_slice %4 {offsets = [0, 24], sizes = [8, 8], strides = [1, 1]} : vector<8x96xbf16> to vector<8x8xbf16>
    %c0_38 = arith.constant 0 : index
    %c3 = arith.constant 3 : index
    %c0_39 = arith.constant 0 : index
    %c0_40 = arith.constant 0 : index
    %42 = vector.load %arg4[%c0_38, %c3, %c0_39, %c0_40] : memref<1x4x8x8xbf16, #tpu.memory_space<vmem>>, vector<1x1x8x8xbf16>
    %43 = vector.shape_cast %42 : vector<1x1x8x8xbf16> to vector<8x8xbf16>
    %44 = vector.shape_cast %41 : vector<8x8xbf16> to vector<1x1x8x8xbf16>
    tpu.vector_store %arg4[%c0_38, %c3, %c0_39, %c0_40], %44 {strides = array<i32>} : memref<1x4x8x8xbf16, #tpu.memory_space<vmem>>, vector<1x1x8x8xbf16>,
    %45 = vector.extract_strided_slice %4 {offsets = [0, 56], sizes = [8, 8], strides = [1, 1]} : vector<8x96xbf16> to vector<8x8xbf16>
    %c0_41 = arith.constant 0 : index
    %c3_42 = arith.constant 3 : index
    %c0_43 = arith.constant 0 : index
    %c0_44 = arith.constant 0 : index
    %46 = vector.load %arg5[%c0_41, %c3_42, %c0_43, %c0_44] : memref<1x4x8x8xbf16, #tpu.memory_space<vmem>>, vector<1x1x8x8xbf16>
    %47 = vector.shape_cast %46 : vector<1x1x8x8xbf16> to vector<8x8xbf16>
    %48 = vector.shape_cast %45 : vector<8x8xbf16> to vector<1x1x8x8xbf16>
    tpu.vector_store %arg5[%c0_41, %c3_42, %c0_43, %c0_44], %48 {strides = array<i32>} : memref<1x4x8x8xbf16, #tpu.memory_space<vmem>>, vector<1x1x8x8xbf16>,
    %49 = vector.extract_strided_slice %4 {offsets = [0, 88], sizes = [8, 8], strides = [1, 1]} : vector<8x96xbf16> to vector<8x8xbf16>
    %c0_45 = arith.constant 0 : index
    %c3_46 = arith.constant 3 : index
    %c0_47 = arith.constant 0 : index
    %c0_48 = arith.constant 0 : index
    %50 = vector.load %arg6[%c0_45, %c3_46, %c0_47, %c0_48] : memref<1x4x8x8xbf16, #tpu.memory_space<vmem>>, vector<1x1x8x8xbf16>
    %51 = vector.shape_cast %50 : vector<1x1x8x8xbf16> to vector<8x8xbf16>
    %52 = vector.shape_cast %49 : vector<8x8xbf16> to vector<1x1x8x8xbf16>
    tpu.vector_store %arg6[%c0_45, %c3_46, %c0_47, %c0_48], %52 {strides = array<i32>} : memref<1x4x8x8xbf16, #tpu.memory_space<vmem>>, vector<1x1x8x8xbf16>,
    return
  }
  func.func @transform_0(%arg0: i32, %arg1: i32) -> (i32, i32, i32) {
    %c0_i32 = arith.constant 0 : i32
    %c0_i32_0 = arith.constant 0 : i32
    return %arg0, %arg1, %c0_i32 : i32, i32, i32
  }
  func.func @transform_1(%arg0: i32, %arg1: i32) -> (i32, i32) {
    %c0_i32 = arith.constant 0 : i32
    %c0_i32_0 = arith.constant 0 : i32
    %c0_i32_1 = arith.constant 0 : i32
    return %c0_i32, %c0_i32_0 : i32, i32
  }
  func.func @transform_2(%arg0: i32, %arg1: i32) -> (i32, i32, i32, i32) {
    %c0_i32 = arith.constant 0 : i32
    %c0_i32_0 = arith.constant 0 : i32
    %c0_i32_1 = arith.constant 0 : i32
    return %arg0, %c0_i32, %arg1, %c0_i32_0 : i32, i32, i32, i32
  }
  func.func @transform_3(%arg0: i32, %arg1: i32) -> (i32, i32, i32, i32) {
    %c0_i32 = arith.constant 0 : i32
    %c0_i32_0 = arith.constant 0 : i32
    %c0_i32_1 = arith.constant 0 : i32
    return %arg0, %c0_i32, %arg1, %c0_i32_0 : i32, i32, i32, i32
  }
  func.func @transform_4(%arg0: i32, %arg1: i32) -> (i32, i32, i32, i32) {
    %c0_i32 = arith.constant 0 : i32
    %c0_i32_0 = arith.constant 0 : i32
    %c0_i32_1 = arith.constant 0 : i32
    return %arg0, %c0_i32, %arg1, %c0_i32_0 : i32, i32, i32, i32
  }
}

</mosaic_0001>

<bundles_post_ra>
// kernel: tpu_custom_call.1
= control target key start
LH: loop header
LB: loop body
LE: loop exit
PB: predicated region body
PF: predicated region fallthrough
CT: control target
= control target key end

     0   :  { %10 = vsyncpa [#allocation3], 0  ;;  %s1217_s0 = inlined_call_operand.hbm [shape: bf16[2,8,32], index: 0, kind: input, shape index: {}]   ;;  %s1218_s1 = inlined_call_operand.hbm [shape: bf16[32,96], index: 1, kind: input, shape index: {}]   ;;  %s1219_s2 = inlined_call_operand.hbm [shape: bf16[2,4,8,8], index: 2, kind: output, shape index: {0}]   ;;  %s1220_s3 = inlined_call_operand.hbm [shape: bf16[2,4,8,8], index: 3, kind: output, shape index: {1}]   ;;  %s1221_s4 = inlined_call_operand.hbm [shape: bf16[2,4,8,8], index: 4, kind: output, shape index: {2}]  }
   0x1   :  { %12 = vsyncpa [#allocation3 + $0x1], 0 }
   0x2   :  { %13 = vsyncpa [#allocation6], 0 }
   0x3   :  { %14 = vsyncpa [#allocation4], 0 }
   0x4   :  { %16 = vsyncpa [#allocation4 + $0x1], 0 }
   0x5   :  { %17 = vsyncpa [#allocation9], 0 }
   0x6   :  { %19 = vsyncpa [#allocation9 + $0x1], 0  ;;  %s979_s15 = smov 0   ;;  %s981_s16 = smov 0  }
   0x7   :  { %s983_s17 = smov 0   ;;  %s985_s18 = smov 0  }
   0x8   :  { %s987_s19 = smov 0   ;;  %s989_s20 = smov 0  }
   0x9 LB: > { %s1010_s21 = sadd.s32 4294967295, %s937_s20   ;;  %p589_p0 = scmp.ge.s32.totalorder %s937_s20, 1  ;;  %s937_s20 = sphi %s989_s20, %s25_s20   ;;  %s933_s19 = sphi %s987_s19, %s1236_s19   ;;  %s929_s18 = sphi %s985_s18, %s1235_s18   ;;  %s925_s17 = sphi %s983_s17, %s1234_s17   ;;  %s921_s16 = sphi %s981_s16, %s1233_s16   ;;  %s917_s15 = sphi %s979_s15, %s1232_s15  }
   0xa   : > { %p60_p1 = scmp.eq.s32.totalorder %s1010_s21, 0  ;;  %p175_p2 = scmp.lt.s32.totalorder %s937_s20, 3 }
   0xb   : > { %s186_s24 = sshll.u32 %s1218_s1, 4  ;;  %s939_s26 = smov [#allocation5]   ;;  %s187_s24 = int_to_ptr.hbm [resolvable:$true] %s186_s24 }
   0xc   : > { %p1018_p3 = pnand %p589_p0, %p175_p2  ;;  %s188_s27 = sshll.u32 %s939_s26, 4  ;;  %s189_s27 = int_to_ptr.vmem [resolvable:$true] %s188_s27 }
   0xd   : > { %p591_p6 = scmp.ge.s32.totalorder %s937_s20, 2  ;;  %s940_s28 = smov 64  }
   0xe   : > { %p646_p4 = pneg %p1018_p3  ;;  %s941_s29 = smov 4  }
   0xf   : > { %s1222_s30 = sadd.s32 4294967294, %s937_s20   ;;  %s37_s5 = sadd.s32 1, %s933_s19 }
  0x10   : > { %p647_p5 = pnand %p646_p4, %p60_p1  ;;  %s46_s6 = sadd.s32 1, %s925_s17 }
  0x11   : > { %p39_p7 = scmp.ge.s32.totalorder %s37_s5, 2  ;;  %p53_p8 = scmp.ne.s32.totalorder %s925_s17, %s921_s16 }
  0x12   : > { %649 = dma.hbm_to_vmem [thread:$0]  (!%p647_p5), %s187_s24, 256, %s189_s27, [#allocation6], %s940_s28, %s940_s28, %s941_s29  }
  0x13   : > { %p54_p9 = scmp.eq.s32.totalorder %s937_s20, 0  ;;  %p59_p10 = scmp.ne.s32.totalorder %s921_s16, %s917_s15 }
  0x14   : > { %s1238_s5 = smov (%p39_p7, %s37_s5), 0  ;;  %p106_p13 = scmp.eq.s32.totalorder %s1010_s21, 1 }
  0x15   : > { %p1037_p11 = por %p54_p9, %p53_p8  ;;  %p1043_p12 = por %p60_p1, %p59_p10 }
  0x16   : > { %s41_s9 = ssub.s32 %s933_s19, %s1238_s5  ;;  %p112_p2 = scmp.eq.s32.totalorder %s1222_s30, 1 }
  0x17   : > { %p44_p0 = scmp.eq.s32.totalorder %s41_s9, 0  ;;  %p1052_p4 = por %p106_p13, %p53_p8 }
  0x18   : > { %p665_p5 = scmp.lt.s32.totalorder %s937_s20, 2  ;;  %p1060_p7 = por %p112_p2, %p59_p10 }
  0x19   : > { %s1058_s11 = scalar_select %p44_p0, %s925_s17, %s46_s6  }
  0x1a   : > { %s202_s13 = sand.u32 1, %s925_s17   ;;  %s593_s22 = sshll.u32 %s933_s19, 2 }
  0x1b   : > { %s592_s14 = sshll.u32 %s202_s13, 2  ;;  %s211_s26 = scalar_lea.hbm %s1217_s0, %s593_s22 }
  0x1c   : > { %s206_s27 = scalar_lea.vmem [#allocation2], %s592_s14  ;;  %s213_s29 = sshll.u32 %s211_s26, 4  ;;  %s214_s29 = int_to_ptr.hbm [resolvable:$true] %s213_s29 }
  0x1d   : > { %s215_s28 = sshll.u32 %s206_s27, 4  ;;  %p651_p8 = pnand %p665_p5, %p1037_p11  ;;  %s216_s28 = int_to_ptr.vmem [resolvable:$true] %s215_s28 }
  0x1e   : > { %s203_s6 = scalar_lea.sflag [#allocation3], %s202_s13  ;;  %224 = sbr.rel (%p1018_p3) target bundleno = 329 (0x149), region = 28 }
  0x1f   : > { %653 = dma.hbm_to_vmem [thread:$0]  (!%p651_p8), %s214_s29, 64, %s216_s28, %s203_s6  }
  0x20   : > { %s1074_s9 = sand.u32 (!%p1018_p3), 1, %s921_s16  }
  0x21   : > { %s595_s23 = sshll.u32 (!%p1018_p3), %s1074_s9, 2  ;;  %s227_s22 = scalar_lea.sflag (!%p1018_p3), [#allocation3], %s1074_s9 }
  0x22   : > { %s230_s14 = scalar_lea.vmem (!%p1018_p3), [#allocation2], %s595_s23 }
  0x23   : > { %900 = dma.done.wait (%p1043_p12), %s227_s22, 64  }
  0x24   : > { %902 = vsyncadd (%p1043_p12), %s227_s22, 4294967232 }
  0x25   : > { %904 = dma.done.wait (%p60_p1), [#allocation6], 256  }
  0x26   : > { %906 = vsyncadd (%p60_p1), [#allocation6], 4294967040  ;;  %v630_v0 = vld [vmem:[#allocation5 + $0x8] sm:$0xff]  ;;  %v629_v1 = vld [vmem:[#allocation5] sm:$0xff]  ;;  %vm289_vm0 = vcmask 261120   ;;  %s1087_s25 = sshll.u32 %s1074_s9, 4 }
  0x27   : > { %299 = vmatpush.bf16.msra.mxu0 %v630_v0  ;;  %v272_v2 = vld [vmem:[%s230_s14] sm:$0xf]  ;;  %vm307_vm1 = vcmask 60416   ;;  %s1223_s7 = smov 64   ;;  %s943_s8 = smov 80  }
  0x28   : > { %s1091_s13 = scalar_lea.vmem [#allocation7], %s1087_s25  ;;  %s944_s24 = smov 96  }
  0x29   : > { %s945_s26 = smov 120   ;;  %s946_s27 = smov 72  }
  0x2a   : > { %s947_s28 = smov 88   ;;  %s948_s29 = smov 48  }
  0x2b   : > { %300 = vmatpush.bf16.msra.mxu0 %v629_v1  ;;  %s949_s6 = smov 112   ;;  %s950_s23 = smov 56  }
  0x2c   : > { %s951_s22 = smov 40   ;;  %s952_s14 = smov 104  }
  0x2e   : > { %608 = vmatmul.msk.bf16.vlgmr.msra.gmra.mxu0 %vm289_vm0, %v272_v2 }
  0xab   : > { %v302_v3 = vpop.f32.mrf.mxu0 }
  0xac   : > { %v306_v4 = vpack.c.bf16 %v302_v3, %v302_v3 }
  0xae   : > { %314 = vrot.lane.b32.xlu2 %v306_v4, %s1223_s7  ;;  %338 = vrot.lane.b32.xlu1 %v306_v4, %s943_s8  ;;  %308 = vst.msk [vmem:[%s1091_s13] sm:$0xf] %vm307_vm1, %v306_v4  ;;  %s1096_s8 = scalar_lea.vmem [#allocation10], %s1087_s25 }
  0xaf   : > { %310 = vrot.lane.b32.xlu0 %v306_v4, %s944_s24  ;;  %s1105_s24 = sshll.u32 %s929_s18, 4 }
  0xb3   : > { %v304_v5 = vpop.f32.mrf.mxu0 }
  0xb6   : > { %318 = vrot.lane.b32.xlu2 %v306_v4, %s945_s26  ;;  %353 = vrot.lane.b32.xlu1 %v306_v4, %s946_s27  ;;  %s263_s26 = scalar_lea.vmem [#allocation8], %s1087_s25 }
  0xb7   : > { %323 = vrot.lane.b32.xlu0 %v306_v4, %s947_s28  ;;  %s811_s28 = scalar_lea.hbm %s1220_s3, 32 }
  0xbe   : > { %343 = vrot.lane.b32.xlu2 %v306_v4, %s948_s29  ;;  %333 = vrot.lane.b32.xlu1 %v306_v4, %s949_s6  ;;  %s404_s29 = scalar_lea.hbm %s1220_s3, %s1105_s24  ;;  %s405_s6 = sshll.u32 %s263_s26, 4  ;;  %s406_s6 = int_to_ptr.vmem [resolvable:$true] %s405_s6 }
  0xbf   : > { %328 = vrot.lane.b32.xlu0 %v306_v4, %s950_s23  ;;  %s368_s23 = sand.u32 1, %s1010_s21  }
  0xc0   : > { %s1117_s18 = scalar_lea.sflag [#allocation9], %s368_s23 }
  0xc6   : > { %358 = vrot.lane.b32.xlu1 %v306_v4, %s951_s22  ;;  %s407_s22 = sshll.u32 %s404_s29, 4  ;;  %s408_s22 = int_to_ptr.hbm [resolvable:$true] %s407_s22 }
  0xc7   : > { %348 = vrot.lane.b32.xlu0 %v306_v4, %s952_s14  ;;  %s805_s25 = sshra.s32 %s408_s22, 4  ;;  %s806_s25 = int_to_ptr.hbm [resolvable:$true] %s805_s25 }
  0xc8   : > { %s807_s14 = scalar_lea.hbm %s806_s25, 16  ;;  %p812_p10 = scmp.lt.s32.totalorder %s806_s25, %s1220_s3 }
  0xc9   : > { %p808_p1 = scmp.ne.s32.totalorder %s806_s25, %s807_s14  ;;  %p813_p11 = scmp.lt.s32.totalorder %s811_s28, %s807_s14 }
  0xcb   : > { %p809_p3 = pnand %p808_p1, %p1052_p4  ;;  %p814_p12 = por %p813_p11, %p812_p10 }
  0xcd   : > { %p810_p9 = pneg %p809_p3 }
  0xcf   : > { %p815_p13 = pnand %p814_p12, %p810_p9 }
 0x108   : > { %v315_v6 = vpop.permute.xlu2 %314 }
 0x109   : > { %317 = vst.msk [vmem:[%s1096_s8] sm:$0xf] %vm307_vm1, %v315_v6 }
 0x110   : > { %v319_v7 = vpop.permute.xlu2 %318 }
 0x111   : > { %609 = vst.msk [vmem:[%s1091_s13 + $0x4] sm:$0xf] %vm307_vm1, %v319_v7 }
 0x118   : > { %v344_v8 = vpop.permute.xlu2 %343 }
 0x119   : > { %614 = vst.msk [vmem:[%s1096_s8 + $0x8] sm:$0xf] %vm307_vm1, %v344_v8 }
 0x120   : > { %v339_v9 = vpop.permute.xlu1 %338 }
 0x121   : > { %613 = vst.msk [vmem:[%s263_s26 + $0x8] sm:$0xf] %vm307_vm1, %v339_v9  ;;  %v311_v10 = vpop.permute.xlu0 %310 }
 0x122   : > { %313 = vst.msk [vmem:[%s263_s26] sm:$0xf] %vm307_vm1, %v311_v10 }
 0x128   : > { %v354_v11 = vpop.permute.xlu1 %353 }
 0x129   : > { %616 = vst.msk [vmem:[%s263_s26 + $0xc] sm:$0xf] %vm307_vm1, %v354_v11  ;;  %v324_v12 = vpop.permute.xlu0 %323 }
 0x12a   : > { %610 = vst.msk [vmem:[%s263_s26 + $0x4] sm:$0xf] %vm307_vm1, %v324_v12 }
 0x12b   : > { %818 = shalt.err (!%p815_p13)
}
 0x12c   : > { %s953_s26 = smov 4   ;;  %s386_s25 = scalar_lea.hbm %s1219_s2, %s1105_s24 }
 0x12d   : > { %641 = dma.vmem_to_hbm [thread:$0]  (%p1052_p4), %s406_s6, 256, %s408_s22, %s1117_s18, %s1223_s7, %s1223_s7, %s953_s26  }
 0x12e   : > { %s422_s21 = scalar_lea.hbm %s1221_s4, %s1105_s24  ;;  %s387_s28 = sshll.u32 %s1091_s13, 4  ;;  %s388_s28 = int_to_ptr.vmem [resolvable:$true] %s387_s28 }
 0x12f   : > { %s1146_s29 = sshll.u32 %s386_s25, 4  ;;  %s423_s6 = sshll.u32 %s1096_s8, 4  ;;  %s390_s29 = int_to_ptr.hbm [resolvable:$true] %s1146_s29  ;;  %s1152_s6 = int_to_ptr.vmem [resolvable:$true] %s423_s6 }
 0x130   : > { %v334_v13 = vpop.permute.xlu1 %333  ;;  %s1149_s22 = sshll.u32 %s422_s21, 4  ;;  %s364_s24 = scalar_lea.sflag [#allocation4], %s1074_s9  ;;  %s426_s22 = int_to_ptr.hbm [resolvable:$true] %s1149_s22 }
 0x131   : > { %612 = vst.msk [vmem:[%s1091_s13 + $0x8] sm:$0xf] %vm307_vm1, %v334_v13  ;;  %v329_v14 = vpop.permute.xlu0 %328  ;;  %s833_s30 = sshra.s32 %s390_s29, 4  ;;  %s839_s27 = scalar_lea.hbm %s1219_s2, 32  ;;  %s834_s30 = int_to_ptr.hbm [resolvable:$true] %s833_s30 }
 0x132   : > { %611 = vst.msk [vmem:[%s1096_s8 + $0x4] sm:$0xf] %vm307_vm1, %v329_v14  ;;  %s835_s23 = scalar_lea.hbm %s834_s30, 16  ;;  %p840_p8 = scmp.lt.s32.totalorder %s834_s30, %s1219_s2 }
 0x133   : > { %p836_p0 = scmp.ne.s32.totalorder %s834_s30, %s835_s23  ;;  %p841_p1 = scmp.lt.s32.totalorder %s839_s27, %s835_s23 }
 0x135   : > { %p837_p2 = pnand %p836_p0, %p1052_p4  ;;  %p842_p3 = por %p841_p1, %p840_p8 }
 0x137   : > { %p838_p5 = pneg %p837_p2 }
 0x138   : > { %v359_v15 = vpop.permute.xlu1 %358 }
 0x139   : > { %617 = vst.msk [vmem:[%s1096_s8 + $0xc] sm:$0xf] %vm307_vm1, %v359_v15  ;;  %v349_v16 = vpop.permute.xlu0 %348  ;;  %p843_p9 = pnand %p842_p3, %p838_p5 }
 0x13a   : > { %615 = vst.msk [vmem:[%s1091_s13 + $0xc] sm:$0xf] %vm307_vm1, %v349_v16 }
 0x13b   : > { %846 = shalt.err (!%p843_p9)
}
 0x13c   : > { %s1230_s9 = smov 64   ;;  %s861_s13 = sshra.s32 %s426_s22, 4  ;;  %s862_s13 = int_to_ptr.hbm [resolvable:$true] %s861_s13 }
 0x13d   : > { %640 = dma.vmem_to_hbm [thread:$0]  (%p1052_p4), %s388_s28, 256, %s390_s29, %s364_s24, %s1230_s9, %s1230_s9, %s953_s26  }
 0x13e   : > { %s863_s8 = scalar_lea.hbm %s862_s13, 16  ;;  %s867_s23 = scalar_lea.hbm %s1221_s4, 32 }
 0x13f   : > { %p864_p10 = scmp.ne.s32.totalorder %s862_s13, %s863_s8  ;;  %p868_p13 = scmp.lt.s32.totalorder %s862_s13, %s1221_s4 }
 0x140   : > { %p869_p0 = scmp.lt.s32.totalorder %s867_s23, %s863_s8 }
 0x141   : > { %p865_p11 = pnand %p864_p10, %p1052_p4 }
 0x142   : > { %p870_p2 = por %p869_p0, %p868_p13 }
 0x143   : > { %p866_p12 = pneg %p865_p11 }
 0x145   : > { %p871_p5 = pnand %p870_p2, %p866_p12 }
 0x147   : > { %874 = shalt.err (!%p871_p5)
}
 0x148   : > { %642 = dma.vmem_to_hbm [thread:$0]  (%p1052_p4), %s1152_s6, 256, %s426_s22, %s1117_s18, %s1230_s9, %s1230_s9, %s953_s26  }
 0x149 PF: > { %s440_s28 = sand.u32 1, %s917_s15   ;;  %p655_p8 = pnand %p591_p6, %p1060_p7 }
 0x14a   : > { %s441_s29 = scalar_lea.sflag [#allocation4], %s440_s28 }
 0x14b   : > { %p656_p1 = pneg %p655_p8 }
 0x14d   : > { %908 = dma.done.wait (%p656_p1), %s441_s29, 256  }
 0x14e   : > { %910 = vsyncadd (%p656_p1), %s441_s29, 4294967040  ;;  %s1231_s10 = sadd.s32 4294967294, %s937_s20  }
 0x14f   : > { %s450_s24 = sand.u32 1, %s1231_s10  }
 0x150   : > { %s451_s27 = scalar_lea.sflag [#allocation9], %s450_s24 }
 0x151   : > { %912 = dma.done.wait (%p656_p1), %s451_s27, 512  }
 0x152   : > { %914 = vsyncadd (%p656_p1), %s451_s27, 4294966784  ;;  %s25_s20 = sadd.s32 1, %s937_s20   ;;  %s1232_s15 = smov %s921_s16 }
 0x153   : > { %p22_p4 = scmp.ge.s32.totalorder %s25_s20, 4   ;;  %s1233_s16 = smov %s925_s17 }
 0x154   : > { %s1234_s17 = smov %s1058_s11  ;;  %s1235_s18 = smov %s933_s19 }
 0x155   : > { %s1236_s19 = smov %s1238_s5  ;;  %24 = sbr.rel (!%p22_p4) target bundleno = 9 (0x9), region = 118 }
 0x15a   :  { %467 = vsyncpa [#allocation3], 1 }
 0x15b   :  { %469 = vsyncpa [#allocation3 + $0x1], 1 }
 0x15c   :  { %470 = vsyncpa [#allocation6], 1 }
 0x15d   :  { %471 = vsyncpa [#allocation4], 1 }
 0x15e   :  { %473 = vsyncpa [#allocation4 + $0x1], 1 }
 0x15f   :  { %474 = vsyncpa [#allocation9], 1 }
 0x160   :  { %476 = vsyncpa [#allocation9 + $0x1], 1 }

</bundles_post_ra>
